<compile_context>
chip_gen: v5e
topology: v5e:2x2
jax: 0.10.0
libtpu: 0.0.40
codegen_flags: <defaults>
</compile_context>

<pallas_src>
import jax
import jax.numpy as jnp
from jax.experimental import pallas as pl
from jax.experimental.pallas import tpu as pltpu


def _round_up(x, m):
    return ((x + m - 1) // m) * m


def _full_spec(arr):
    return pl.BlockSpec(arr.shape, lambda i: (0, 0))


def _balanced_tiles(total, tile, *, min_split=4096):
    """16-aligned tile size + padded extent; >=2 grid steps when `total` is
    large (so the v7x megacore can split the axis) and no near-empty tail."""
    tile = max(16, min(tile, _round_up(total, 16)))
    n_tiles = pl.cdiv(total, tile)
    if total >= min_split and n_tiles < 2:
        n_tiles = 2
    tile = _round_up(pl.cdiv(total, n_tiles), 16)
    padded = n_tiles * tile
    return tile, padded, n_tiles


# ----------------------------------------------------------------------------
# Kernel 1: fused node FeedForwards (FFN1 | FFN2 in one bf16 matmul chain).
#   out[:, :in_f] = FFN1(h_tile), out[:, in_f:] = FFN2(h_tile)   (bf16)
# ----------------------------------------------------------------------------
def _node_ffn_kernel(h_ref, w1_ref, b1_ref, w2_ref, b2_ref, out_ref):
    f32, bf16 = jnp.float32, jnp.bfloat16
    a = jnp.maximum(
        jnp.dot(h_ref[...], w1_ref[...], preferred_element_type=f32) + b1_ref[...],
        0.0)
    z = jnp.dot(a.astype(bf16), w2_ref[...], preferred_element_type=f32) + b2_ref[...]
    out_ref[...] = jnp.maximum(z, 0.0).astype(out_ref.dtype)


def _node_ffn_pallas(h, params, *, tile_n=2048):
    n, in_f = h.shape
    d_ff = params["n1w1"].shape[1]
    f32, bf16 = jnp.float32, jnp.bfloat16

    tile_n, n_pad, n_tiles = _balanced_tiles(n, tile_n)
    h16 = h.astype(bf16)
    if n_pad != n:
        h16 = jnp.pad(h16, ((0, n_pad - n), (0, 0)))

    # Fuse FFN1/FFN2: layer-1 weights side-by-side, layer-2 weights block-diag.
    w1n = jnp.concatenate([params["n1w1"], params["n2w1"]], axis=1).astype(bf16)  # (in_f, 2*d_ff)
    b1n = jnp.concatenate([params["n1b1"], params["n2b1"]], axis=1)               # (1, 2*d_ff) f32
    zblk = jnp.zeros((d_ff, in_f), f32)
    w2n = jnp.concatenate(
        [jnp.concatenate([params["n1w2"], zblk], axis=1),
         jnp.concatenate([zblk, params["n2w2"]], axis=1)], axis=0).astype(bf16)   # (2*d_ff, 2*in_f)
    b2n = jnp.concatenate([params["n1b2"], params["n2b2"]], axis=1)               # (1, 2*in_f) f32

    weights = (w1n, b1n, w2n, b2n)

    grid_spec = pltpu.PrefetchScalarGridSpec(
        num_scalar_prefetch=0,
        grid=(n_tiles,),
        in_specs=[pl.BlockSpec((tile_n, in_f), lambda i: (i, 0))]
                 + [_full_spec(w) for w in weights],
        out_specs=pl.BlockSpec((tile_n, 2 * in_f), lambda i: (i, 0)),
    )

    out = pl.pallas_call(
        _node_ffn_kernel,
        out_shape=jax.ShapeDtypeStruct((n_pad, 2 * in_f), bf16),
        grid_spec=grid_spec,
        compiler_params=pltpu.CompilerParams(
            dimension_semantics=("parallel",),
            vmem_limit_bytes=32 * 1024 * 1024),
    )(h16, *weights)
    return out[:n]   # (N, 2*in_f) bf16 combined [hu2 | hv2]


# ----------------------------------------------------------------------------
# Kernel 2: 3-layer edge MLP on a lane-dense bf16 slab (one edge tile).
# ----------------------------------------------------------------------------
def _edge_mlp_kernel(x_ref, w1_ref, b1_ref, w2_ref, b2_ref, w3_ref, b3_ref,
                     out_ref):
    f32, bf16 = jnp.float32, jnp.bfloat16
    lrelu = lambda v: jnp.where(v > 0, v, 0.01 * v)  # nn.LeakyReLU default slope

    # x_ref is bf16; one fused K=128 bf16 MXU dot replaces the split concat dots.
    z1 = jnp.dot(x_ref[...], w1_ref[...], preferred_element_type=f32) + b1_ref[...]
    e1 = lrelu(z1)
    z2 = jnp.dot(e1.astype(bf16), w2_ref[...], preferred_element_type=f32) + b2_ref[...]
    e2 = lrelu(z2)
    z3 = jnp.dot(e2.astype(bf16), w3_ref[...], preferred_element_type=f32) + b3_ref[...]
    # bf16 store halves the output HBM writeback vs f32.
    # TODO(synk): a lane-dense (tile_e//4, 128) repack would also remove the
    # masked 32/128-lane stores; only worth it if the store slot binds (v5e).
    out_ref[...] = lrelu(z3).astype(out_ref.dtype)


# ----------------------------------------------------------------------------
# Full EdgeUpdate forward.
# ----------------------------------------------------------------------------
def edge_update_pallas(h, edge_feat, src, dst, params, *, tile_e=8192, tile_n=2048):
    bf16 = jnp.bfloat16
    e_num = edge_feat.shape[0]
    in_f = h.shape[1]
    edge_f = edge_feat.shape[1]
    out_f = params["w3"].shape[1]

    # 1) Fused node FFNs once over N nodes (bf16 MXU, f32 accumulate).
    node_out = _node_ffn_pallas(h, params, tile_n=tile_n)   # (N, 2*in_f) bf16

    # 2) Gather per-edge rows and build a lane-dense bf16 slab
    #    [hu2[src] | hv2[dst] | ef | 0-pad] with K padded to 128.
    # TODO(synk): for E >> N this (E,128) slab round-trip through HBM dominates
    # traffic; keeping node_out VMEM-resident and gathering src/dst rows
    # in-kernel would remove it, but per-row dynamic gather has no robust
    # Pallas TPU lowering here, so the gather stays XLA glue.
    k_cat = 2 * in_f + edge_f
    k_pad = _round_up(k_cat, 128)
    tile_e, e_pad, n_tiles = _balanced_tiles(e_num, tile_e)

    x = jnp.concatenate(
        [node_out[src, :in_f], node_out[dst, in_f:], edge_feat.astype(bf16)],
        axis=1)
    x = jnp.pad(x, ((0, e_pad - e_num), (0, k_pad - k_cat)))

    # 3) Weight prep: fuse W1's three blocks into one (k_pad, hid2) bf16 matrix.
    w1cat = jnp.concatenate([params["w1u"], params["w1v"], params["w1e"]], axis=0)
    w1cat = jnp.pad(w1cat, ((0, k_pad - k_cat), (0, 0))).astype(bf16)
    w2 = params["w2"].astype(bf16)
    w3 = params["w3"].astype(bf16)
    b1, b2, b3 = params["w1b"], params["w2b"], params["w3b"]
    weights = (w1cat, b1, w2, b2, w3, b3)

    # TODO(synk): pipeline_mode=pl.Buffered(3) on the edge input is a minor v7x
    # win; left at the default double buffer for portability.
    edge_in_spec = pl.BlockSpec((tile_e, k_pad), lambda i: (i, 0))
    edge_out_spec = pl.BlockSpec((tile_e, out_f), lambda i: (i, 0))

    grid_spec = pltpu.PrefetchScalarGridSpec(
        num_scalar_prefetch=0,
        grid=(n_tiles,),
        in_specs=[edge_in_spec] + [_full_spec(w) for w in weights],
        out_specs=edge_out_spec,
    )

    out = pl.pallas_call(
        _edge_mlp_kernel,
        out_shape=jax.ShapeDtypeStruct((e_pad, out_f), bf16),
        grid_spec=grid_spec,
        compiler_params=pltpu.CompilerParams(
            dimension_semantics=("parallel",),
            vmem_limit_bytes=32 * 1024 * 1024),
    )(x, *weights)
    return out[:e_num]   # bf16; padded rows (lrelu(bias) garbage) sliced off


# ----------------------------------------------------------------------------
# Deterministic parameter construction (+ BatchNorm folding, eval mode).
# ----------------------------------------------------------------------------
def _fold_linear_bn(w, b, gamma, beta, mean, var, eps=1e-5):
    scale = gamma / jnp.sqrt(var + eps)
    w_f = w * scale[None, :]
    b_f = (b - mean) * scale + beta
    return w_f, b_f.reshape(1, -1)


def make_params(key, in_feats, edge_infeat, hid_feats, out_feats):
    d_ff = in_feats * 2
    hid2 = hid_feats * 2
    keys = iter(jax.random.split(key, 64))

    def lin_init(fan_in, fan_out):
        bound = 1.0 / jnp.sqrt(fan_in)
        w = jax.random.uniform(next(keys), (fan_in, fan_out), jnp.float32, -bound, bound)
        b = jax.random.uniform(next(keys), (fan_out,), jnp.float32, -bound, bound)
        return w, b

    def bn_init(n):
        gamma = 1.0 + 0.1 * jax.random.normal(next(keys), (n,), jnp.float32)
        beta = 0.1 * jax.random.normal(next(keys), (n,), jnp.float32)
        mean = 0.1 * jax.random.normal(next(keys), (n,), jnp.float32)
        var = jax.random.uniform(next(keys), (n,), jnp.float32, 0.5, 1.5)
        return gamma, beta, mean, var

    params = {}
    for tag in ("n1", "n2"):
        w1, b1 = lin_init(in_feats, d_ff)
        w1f, b1f = _fold_linear_bn(w1, b1, *bn_init(d_ff))
        w2, b2 = lin_init(d_ff, in_feats)
        w2f, b2f = _fold_linear_bn(w2, b2, *bn_init(in_feats))
        params[f"{tag}w1"], params[f"{tag}b1"] = w1f, b1f
        params[f"{tag}w2"], params[f"{tag}b2"] = w2f, b2f

    w1, b1 = lin_init(2 * in_feats + edge_infeat, hid2)
    w1f, b1f = _fold_linear_bn(w1, b1, *bn_init(hid2))
    params["w1u"] = w1f[:in_feats]
    params["w1v"] = w1f[in_feats:2 * in_feats]
    params["w1e"] = w1f[2 * in_feats:]
    params["w1b"] = b1f

    w2, b2 = lin_init(hid2, hid_feats)
    params["w2"], params["w2b"] = _fold_linear_bn(w2, b2, *bn_init(hid_feats))
    w3, b3 = lin_init(hid_feats, out_feats)
    params["w3"], params["w3b"] = _fold_linear_bn(w3, b3, *bn_init(out_feats))
    return params


# ----------------------------------------------------------------------------
# Pure-JAX reference (same math, matching bf16 matmul casts on both paths).
# ----------------------------------------------------------------------------
def edge_update_ref(h, edge_feat, src, dst, p):
    f32 = jnp.float32
    bf16 = jnp.bfloat16
    relu = lambda x: jnp.maximum(x, 0.0)
    lrelu = lambda x: jnp.where(x > 0, x, 0.01 * x)
    d = lambda a, w: jnp.dot(a.astype(bf16), w.astype(bf16), preferred_element_type=f32)

    hu = h[src]
    hv = h[dst]
    hu2 = relu(d(relu(d(hu, p["n1w1"]) + p["n1b1"]), p["n1w2"]) + p["n1b2"])
    hv2 = relu(d(relu(d(hv, p["n2w1"]) + p["n2b1"]), p["n2w2"]) + p["n2b2"])
    x = jnp.concatenate([hu2, hv2, edge_feat], axis=1)
    w1 = jnp.concatenate([p["w1u"], p["w1v"], p["w1e"]], axis=0)
    e1 = lrelu(d(x, w1) + p["w1b"])
    e2 = lrelu(d(e1, p["w2"]) + p["w2b"])
    e3 = lrelu(d(e2, p["w3"]) + p["w3b"])
    return e3.astype(bf16).astype(f32)   # kernel emits bf16


if __name__ == "__main__":
    in_feats, edge_infeat, hid_feats, out_feats = 32, 16, 32, 32
    n_nodes, n_edges = 64, 256

    key = jax.random.PRNGKey(0)
    k_h, k_e, k_src, k_dst, k_p = jax.random.split(key, 5)

    h = jax.random.normal(k_h, (n_nodes, in_feats), jnp.float32)
    edge_feat = jax.random.normal(k_e, (n_edges, edge_infeat), jnp.float32)
    src = jax.random.randint(k_src, (n_edges,), 0, n_nodes)
    dst = jax.random.randint(k_dst, (n_edges,), 0, n_nodes)

    params = make_params(k_p, in_feats, edge_infeat, hid_feats, out_feats)

    out = edge_update_pallas(h, edge_feat, src, dst, params)
    out = jax.block_until_ready(out)

    ref = edge_update_ref(h, edge_feat, src, dst, params)
    assert out.shape == (n_edges, out_feats)
    assert jnp.allclose(out.astype(jnp.float32), ref, atol=2e-2, rtol=2e-2), \
        "mismatch vs JAX reference"

    # TODO(synk): dropout is treated as identity and BatchNorm uses folded
    # running statistics (eval mode), not batch statistics.
    print("KERNEL_OK")
</pallas_src>

<mosaic_0001>
module attributes {stable_mosaic.version = 11 : i64} {
  func.func @_node_ffn_kernel(%arg0: i32, %arg1: memref<64x32xbf16, #tpu.memory_space<vmem>>, %arg2: memref<32x128xbf16, #tpu.memory_space<vmem>>, %arg3: memref<1x128xf32, #tpu.memory_space<vmem>>, %arg4: memref<128x64xbf16, #tpu.memory_space<vmem>>, %arg5: memref<1x64xf32, #tpu.memory_space<vmem>>, %arg6: memref<64x64xbf16, #tpu.memory_space<vmem>>) attributes {dimension_semantics = [#tpu.dimension_semantics<parallel>], iteration_bounds = array<i64: 1>, scalar_prefetch = 0 : i64, scratch_operands = 0 : i64, tpu.core_type = #tpu.core_type<tc>, window_params = [{transform_indices = @transform_0, window_bounds = array<i64: 64, 32>}, {pipeline_mode = #tpu.pipeline_mode<synchronous>, transform_indices = @transform_1, window_bounds = array<i64: 32, 128>}, {pipeline_mode = #tpu.pipeline_mode<synchronous>, transform_indices = @transform_2, window_bounds = array<i64: 1, 128>}, {pipeline_mode = #tpu.pipeline_mode<synchronous>, transform_indices = @transform_3, window_bounds = array<i64: 128, 64>}, {pipeline_mode = #tpu.pipeline_mode<synchronous>, transform_indices = @transform_4, window_bounds = array<i64: 1, 64>}, {transform_indices = @transform_5, window_bounds = array<i64: 64, 64>}]} {
    %c0 = arith.constant 0 : index
    %c0_0 = arith.constant 0 : index
    %0 = vector.load %arg1[%c0, %c0_0] : memref<64x32xbf16, #tpu.memory_space<vmem>>, vector<64x32xbf16>
    %c0_1 = arith.constant 0 : index
    %c0_2 = arith.constant 0 : index
    %1 = vector.load %arg2[%c0_1, %c0_2] : memref<32x128xbf16, #tpu.memory_space<vmem>>, vector<32x128xbf16>
    %cst = arith.constant dense<0.000000e+00> : vector<64x128xf32>
    %2 = tpu.matmul %0, %1, %cst {dimension_numbers = #tpu.dot_dimension_numbers<[1], [0], [0], [1], [0, 0, 1, 1], [], []>} : vector<64x32xbf16>, vector<32x128xbf16>, vector<64x128xf32> -> vector<64x128xf32>
    %c0_3 = arith.constant 0 : index
    %c0_4 = arith.constant 0 : index
    %3 = vector.load %arg3[%c0_3, %c0_4] : memref<1x128xf32, #tpu.memory_space<vmem>>, vector<1x128xf32>
    %4 = vector.broadcast %3 : vector<1x128xf32> to vector<64x128xf32>
    %5 = arith.addf %2, %4 : vector<64x128xf32>
    %cst_5 = arith.constant 0.000000e+00 : f32
    %6 = vector.broadcast %cst_5 : f32 to vector<64x128xf32>
    %7 = arith.maximumf %5, %6 : vector<64x128xf32>
    %8 = arith.truncf %7 : vector<64x128xf32> to vector<64x128xbf16>
    %c0_6 = arith.constant 0 : index
    %c0_7 = arith.constant 0 : index
    %9 = vector.load %arg4[%c0_6, %c0_7] : memref<128x64xbf16, #tpu.memory_space<vmem>>, vector<128x64xbf16>
    %cst_8 = arith.constant dense<0.000000e+00> : vector<64x64xf32>
    %10 = tpu.matmul %8, %9, %cst_8 {dimension_numbers = #tpu.dot_dimension_numbers<[1], [0], [0], [1], [0, 0, 1, 1], [], []>} : vector<64x128xbf16>, vector<128x64xbf16>, vector<64x64xf32> -> vector<64x64xf32>
    %c0_9 = arith.constant 0 : index
    %c0_10 = arith.constant 0 : index
    %11 = vector.load %arg5[%c0_9, %c0_10] : memref<1x64xf32, #tpu.memory_space<vmem>>, vector<1x64xf32>
    %12 = vector.broadcast %11 : vector<1x64xf32> to vector<64x64xf32>
    %13 = arith.addf %10, %12 : vector<64x64xf32>
    %cst_11 = arith.constant 0.000000e+00 : f32
    %14 = vector.broadcast %cst_11 : f32 to vector<64x64xf32>
    %15 = arith.maximumf %13, %14 : vector<64x64xf32>
    %16 = arith.truncf %15 : vector<64x64xf32> to vector<64x64xbf16>
    %c0_12 = arith.constant 0 : index
    %c0_13 = arith.constant 0 : index
    %17 = vector.load %arg6[%c0_12, %c0_13] : memref<64x64xbf16, #tpu.memory_space<vmem>>, vector<64x64xbf16>
    tpu.vector_store %arg6[%c0_12, %c0_13], %16 {strides = array<i32>} : memref<64x64xbf16, #tpu.memory_space<vmem>>, vector<64x64xbf16>,
    return
  }
  func.func @transform_0(%arg0: i32) -> (i32, i32) {
    %c0_i32 = arith.constant 0 : i32
    %c0_i32_0 = arith.constant 0 : i32
    return %arg0, %c0_i32 : i32, i32
  }
  func.func @transform_1(%arg0: i32) -> (i32, i32) {
    %c0_i32 = arith.constant 0 : i32
    %c0_i32_0 = arith.constant 0 : i32
    %c0_i32_1 = arith.constant 0 : i32
    return %c0_i32, %c0_i32_0 : i32, i32
  }
  func.func @transform_2(%arg0: i32) -> (i32, i32) {
    %c0_i32 = arith.constant 0 : i32
    %c0_i32_0 = arith.constant 0 : i32
    %c0_i32_1 = arith.constant 0 : i32
    return %c0_i32, %c0_i32_0 : i32, i32
  }
  func.func @transform_3(%arg0: i32) -> (i32, i32) {
    %c0_i32 = arith.constant 0 : i32
    %c0_i32_0 = arith.constant 0 : i32
    %c0_i32_1 = arith.constant 0 : i32
    return %c0_i32, %c0_i32_0 : i32, i32
  }
  func.func @transform_4(%arg0: i32) -> (i32, i32) {
    %c0_i32 = arith.constant 0 : i32
    %c0_i32_0 = arith.constant 0 : i32
    %c0_i32_1 = arith.constant 0 : i32
    return %c0_i32, %c0_i32_0 : i32, i32
  }
  func.func @transform_5(%arg0: i32) -> (i32, i32) {
    %c0_i32 = arith.constant 0 : i32
    %c0_i32_0 = arith.constant 0 : i32
    return %arg0, %c0_i32 : i32, i32
  }
}

</mosaic_0001>

<bundles_post_ra>
// kernel: tpu_custom_call.1
= control target key start
LH: loop header
LB: loop body
LE: loop exit
PB: predicated region body
PF: predicated region fallthrough
CT: control target
= control target key end

     0   :  { %s483_s0 = inlined_call_operand.vmem [shape: bf16[64,32], index: 0, kind: input, shape index: {}]   ;;  %s484_s1 = inlined_call_operand.vmem [shape: bf16[32,128], index: 1, kind: input, shape index: {}]   ;;  %s485_s2 = inlined_call_operand.vmem [shape: f32[1,128], index: 2, kind: input, shape index: {}]   ;;  %s486_s3 = inlined_call_operand.vmem [shape: bf16[128,64], index: 3, kind: input, shape index: {}]   ;;  %s487_s4 = inlined_call_operand.vmem [shape: f32[1,64], index: 4, kind: input, shape index: {}]   ;;  %s488_s5 = inlined_call_operand.hbm [shape: bf16[64,64], index: 5, kind: output, shape index: {}]  }
   0x1   :  { %v329_v0 = vld [vmem:[%s484_s1 + $0x8] sm:$0xff]  ;;  %v328_v1 = vld [vmem:[%s484_s1] sm:$0xff] }
   0x2   :  { %338 = vmatpush.bf16.msra.mxu3 %v329_v0  ;;  %89 = vmatpush.bf16.msra.mxu0 %v329_v0 }
   0x3   :  { %10 = vsyncpa [#allocation3], 0  ;;  %v325_v2 = vld [vmem:[%s483_s0 + $0x8] sm:$0xff]  ;;  %v324_v3 = vld [vmem:[%s483_s0] sm:$0xff]  ;;  %vm70_vm0 = vcmask 261120   ;;  %vm237_vm1 = vcmask 519168  }
   0x4   :  { %v337_v4 = vld [vmem:[%s486_s3 + $0x38] sm:$0xff]  ;;  %v336_v5 = vld [vmem:[%s486_s3 + $0x30] sm:$0xff]  ;;  %v335_v6 = vld [vmem:[%s486_s3 + $0x28] sm:$0xff]  ;;  %s252_s24 = sshll.u32 %s488_s5, 4  ;;  %s388_s25 = smov 64   ;;  %s253_s24 = int_to_ptr.hbm [resolvable:$true] %s252_s24 }
   0x5   :  { %340 = vmatpush.bf16.msra.mxu1 %v337_v4  ;;  %341 = vmatpush.bf16.msra.mxu2 %v337_v4  ;;  %v334_v7 = vld [vmem:[%s486_s3 + $0x20] sm:$0xff]  ;;  %v326_v8 = vld [vmem:[%s483_s0 + $0x10] sm:$0xff]  ;;  %v327_v9 = vld [vmem:[%s483_s0 + $0x18] sm:$0xff]  ;;  %s389_s26 = smov 4  }
   0x6   :  { %339 = vmatpush.bf16.msra.mxu3 %v328_v1  ;;  %90 = vmatpush.bf16.msra.mxu0 %v328_v1  ;;  %v333_v10 = vld [vmem:[%s486_s3 + $0x18] sm:$0xff]  ;;  %v332_v11 = vld [vmem:[%s486_s3 + $0x10] sm:$0xff]  ;;  %v331_v12 = vld [vmem:[%s486_s3 + $0x8] sm:$0xff] }
   0x7   :  { %v330_v13 = vld [vmem:[%s486_s3] sm:$0xff] }
   0x8   :  { %v359_v15 = vld [vmem:[%s485_s2] ss:$0 sm:$0xff] }
   0x9   :  { %289 = vmatmul.msk.bf16.vlgmr.msra.gmra.mxu3 %vm70_vm0, %v325_v2  ;;  %288 = vmatmul.msk.bf16.vlgmr.msra.gmra.mxu0 %vm70_vm0, %v324_v3  ;;  %v360_v43 = vld [vmem:[%s487_s4] ss:$0 sm:$0xff]  ;;  %s387_s4 = smov [#allocation2]  }
   0xa   :  { %192 = vmatpush.bf16.msrb.mxu0 %v337_v4  ;;  %342 = vmatpush.bf16.msra.mxu1 %v336_v5  ;;  %s250_s21 = sshll.u32 %s387_s4, 4  ;;  %s251_s21 = int_to_ptr.vmem [resolvable:$true] %s250_s21 }
   0xb   :  { %343 = vmatpush.bf16.msra.mxu2 %v336_v5 }
   0xe   :  { %193 = vmatpush.bf16.msrb.mxu0 %v336_v5  ;;  %344 = vmatpush.bf16.msra.mxu1 %v335_v6 }
   0xf   :  { %345 = vmatpush.bf16.msra.mxu2 %v335_v6 }
  0x12   :  { %194 = vmatpush.bf16.msrb.mxu0 %v335_v6  ;;  %346 = vmatpush.bf16.msra.mxu1 %v334_v7 }
  0x13   :  { %347 = vmatpush.bf16.msra.mxu2 %v334_v7 }
  0x16   :  { %195 = vmatpush.bf16.msrb.mxu0 %v334_v7  ;;  %348 = vmatpush.bf16.msra.mxu1 %v333_v10 }
  0x17   :  { %349 = vmatpush.bf16.msra.mxu2 %v333_v10 }
  0x19   :  { %290 = vmatmul.msk.bf16.gmra.mxu3 %vm70_vm0, %v326_v8 }
  0x1a   :  { %196 = vmatpush.bf16.msrb.mxu0 %v333_v10  ;;  %350 = vmatpush.bf16.msra.mxu1 %v332_v11 }
  0x1b   :  { %351 = vmatpush.bf16.msra.mxu2 %v332_v11 }
  0x1e   :  { %197 = vmatpush.bf16.msrb.mxu0 %v332_v11  ;;  %352 = vmatpush.bf16.msra.mxu1 %v331_v12 }
  0x1f   :  { %353 = vmatpush.bf16.msra.mxu2 %v331_v12 }
  0x22   :  { %198 = vmatpush.bf16.msrb.mxu0 %v331_v12  ;;  %354 = vmatpush.bf16.msra.mxu1 %v330_v13 }
  0x23   :  { %355 = vmatpush.bf16.msra.mxu2 %v330_v13 }
  0x26   :  { %199 = vmatpush.bf16.msrb.mxu0 %v330_v13 }
  0x29   :  { %291 = vmatmul.msk.bf16.gmra.mxu3 %vm70_vm0, %v327_v9 }
  0x86   :  { %v92_v14 = vpop.f32.mrf.mxu0 }
  0x87   :  { %v93_v16 = vadd.f32 %v359_v15, %v92_v14 }
  0x89   :  { %v112_v19 = vmax.f32 %v93_v16, 0.0 }
  0x8c   :  { %v97_v17 = vpop.f32.mrf.mxu3 }
  0x8d   :  { %v98_v22 = vadd.f32 %v359_v15, %v97_v17 }
  0x8e   :  { %v94_v18 = vpop.f32.mrf.mxu0 }
  0x8f   :  { %v95_v20 = vadd.f32 %v359_v15, %v94_v18  ;;  %v114_v26 = vmax.f32 %v98_v22, 0.0 }
  0x91   :  { %v113_v21 = vmax.f32 %v95_v20, 0.0 }
  0x93   :  { %v120_v23 = vpack.c.bf16 %v113_v21, %v112_v19 }
  0x94   :  { %v99_v24 = vpop.f32.mrf.mxu3 }
  0x95   :  { %v100_v25 = vadd.f32 %v359_v15, %v99_v24  ;;  %200 = vmatmul.bf16.vlgmr.msrb.gmra.mxu0 %v120_v23 }
  0x97   :  { %v115_v27 = vmax.f32 %v100_v25, 0.0 }
  0x99   :  { %v121_v28 = vpack.c.bf16 %v115_v27, %v114_v26 }
  0x9b   :  { %205 = vmatmul.bf16.vlgmr.msra.gmra.mxu1 %v121_v28 }
  0x9c   :  { %v102_v29 = vpop.f32.mrf.mxu3 }
  0x9d   :  { %v103_v30 = vadd.f32 %v359_v15, %v102_v29 }
  0x9f   :  { %v116_v33 = vmax.f32 %v103_v30, 0.0 }
  0xa4   :  { %v104_v31 = vpop.f32.mrf.mxu3 }
  0xa5   :  { %v105_v32 = vadd.f32 %v359_v15, %v104_v31 }
  0xa7   :  { %v117_v34 = vmax.f32 %v105_v32, 0.0 }
  0xa9   :  { %v122_v35 = vpack.c.bf16 %v117_v34, %v116_v33 }
  0xab   :  { %210 = vmatmul.bf16.vlgmr.msra.gmra.mxu2 %v122_v35 }
  0xac   :  { %v107_v36 = vpop.f32.mrf.mxu3 }
  0xad   :  { %v108_v37 = vadd.f32 %v359_v15, %v107_v36 }
  0xaf   :  { %v118_v40 = vmax.f32 %v108_v37, 0.0 }
  0xb4   :  { %v109_v38 = vpop.f32.mrf.mxu3 }
  0xb5   :  { %v110_v39 = vadd.f32 %v359_v15, %v109_v38 }
  0xb7   :  { %v119_v41 = vmax.f32 %v110_v39, 0.0 }
  0xb9   :  { %v123_v42 = vpack.c.bf16 %v119_v41, %v118_v40 }
  0xbb   :  { %215 = vmatmul.bf16.gmra.mxu2 %v123_v42 }
 0x112   :  { %v201_v44 = vpop.f32.mrf.mxu0 }
 0x113   :  { %v202_v45 = vadd.f32 %v360_v43, %v201_v44 }
 0x115   :  { %v221_v46 = vmax.f32 %v202_v45, 0.0 }
 0x117   :  { %v229_v47 = vpack.c.bf16 %v221_v46, %v221_v46 }
 0x118   :  { %v206_v48 = vpop.f32.mrf.mxu1 }
 0x119   :  { %v207_v49 = vadd.f32 %v360_v43, %v206_v48  ;;  %238 = vst.msk [vmem:[#allocation2] sm:$0xf] %vm237_vm1, %v229_v47 }
 0x11a   :  { %v203_v50 = vpop.f32.mrf.mxu0 }
 0x11b   :  { %v223_v51 = vmax.f32 %v207_v49, 0.0  ;;  %v204_v52 = vadd.f32 %v360_v43, %v203_v50 }
 0x11d   :  { %v231_v53 = vpack.c.bf16 %v223_v51, %v223_v51  ;;  %v222_v54 = vmax.f32 %v204_v52, 0.0 }
 0x11f   :  { %240 = vst.msk [vmem:[#allocation2 + $0x8] sm:$0xf] %vm237_vm1, %v231_v53  ;;  %v230_v55 = vpack.c.bf16 %v222_v54, %v222_v54 }
 0x120   :  { %v208_v56 = vpop.f32.mrf.mxu1 }
 0x121   :  { %v209_v57 = vadd.f32 %v360_v43, %v208_v56  ;;  %239 = vst.msk [vmem:[#allocation2 + $0x4] sm:$0xf] %vm237_vm1, %v230_v55 }
 0x123   :  { %v224_v58 = vmax.f32 %v209_v57, 0.0 }
 0x125   :  { %v232_v59 = vpack.c.bf16 %v224_v58, %v224_v58 }
 0x127   :  { %241 = vst.msk [vmem:[#allocation2 + $0xc] sm:$0xf] %vm237_vm1, %v232_v59 }
 0x12e   :  { %v211_v60 = vpop.f32.mrf.mxu2 }
 0x12f   :  { %v212_v61 = vadd.f32 %v360_v43, %v211_v60 }
 0x131   :  { %v225_v62 = vmax.f32 %v212_v61, 0.0 }
 0x133   :  { %v233_v63 = vpack.c.bf16 %v225_v62, %v225_v62 }
 0x135   :  { %242 = vst.msk [vmem:[#allocation2 + $0x10] sm:$0xf] %vm237_vm1, %v233_v63 }
 0x136   :  { %v213_v0 = vpop.f32.mrf.mxu2 }
 0x137   :  { %v214_v1 = vadd.f32 %v360_v43, %v213_v0 }
 0x139   :  { %v226_v2 = vmax.f32 %v214_v1, 0.0 }
 0x13b   :  { %v234_v3 = vpack.c.bf16 %v226_v2, %v226_v2 }
 0x13d   :  { %243 = vst.msk [vmem:[#allocation2 + $0x14] sm:$0xf] %vm237_vm1, %v234_v3 }
 0x13e   :  { %v216_v4 = vpop.f32.mrf.mxu2 }
 0x13f   :  { %v217_v5 = vadd.f32 %v360_v43, %v216_v4 }
 0x141   :  { %v227_v6 = vmax.f32 %v217_v5, 0.0 }
 0x143   :  { %v235_v7 = vpack.c.bf16 %v227_v6, %v227_v6 }
 0x145   :  { %244 = vst.msk [vmem:[#allocation2 + $0x18] sm:$0xf] %vm237_vm1, %v235_v7 }
 0x146   :  { %v218_v8 = vpop.f32.mrf.mxu2 }
 0x147   :  { %v219_v9 = vadd.f32 %v360_v43, %v218_v8 }
 0x149   :  { %v228_v10 = vmax.f32 %v219_v9, 0.0 }
 0x14b   :  { %v236_v11 = vpack.c.bf16 %v228_v10, %v228_v10 }
 0x14d   :  { %245 = vst.msk [vmem:[#allocation2 + $0x1c] sm:$0xf] %vm237_vm1, %v236_v11 }
 0x14e   :  { %258 = dma.vmem_to_hbm [thread:$0]  %s251_s21, 512, %s253_s24, [#allocation3], %s388_s25, %s388_s25, %s389_s26  }
 0x14f   :  { %385 = dma.done.wait [#allocation3], 512  }
 0x150   :  { %386 = vsyncadd [#allocation3], 4294966784 }
 0x151   :  { %263 = vsyncpa [#allocation3], 1 }

</bundles_post_ra>
